<compile_context>
chip_gen: v5e
topology: v5e:2x2
jax: 0.10.0
libtpu: 0.0.40
codegen_flags: <defaults>
</compile_context>

<pallas_src>
import functools

import jax
import jax.numpy as jnp
from jax import lax
from jax.experimental import pallas as pl
from jax.experimental.pallas import tpu as pltpu


# ----------------------------- fused Pallas kernel ------------------------------

def _net_fwd_kernel(*refs, num_layers):
    # refs = (x, w0, b0, w1, b1, ..., w_{L-1}, b_{L-1}, P, mask, out)
    x_ref = refs[0]
    wbs = refs[1:1 + 2 * num_layers]
    p_ref = refs[1 + 2 * num_layers]
    mask_ref = refs[2 + 2 * num_layers]
    o_ref = refs[3 + 2 * num_layers]

    # --- MLP: relu(Linear(...)) for all but last layer, plain Linear for the last ---
    h = x_ref[...]                                         # bf16 [N, FP] (pre-cast, lane-padded)
    for li in range(num_layers - 1):
        w = wbs[2 * li][...]                               # bf16 [Din, Dout]
        b = wbs[2 * li + 1][...]                           # f32  [1, Dout]
        h = jnp.dot(h, w, preferred_element_type=jnp.float32) + b
        h = jnp.maximum(h, 0.0).astype(w.dtype)            # relu in f32 (VPU), pack for next MXU op
    w = wbs[-2][...]                                       # bf16 [HP, CP]
    b = wbs[-1][...]                                       # f32  [1, CP]
    z = jnp.dot(h, w, preferred_element_type=jnp.float32) + b     # f32 [N, CP]

    # --- APPNP propagation collapsed to a single matmul with the precomputed matrix P ---
    p = p_ref[...]                                         # bf16 [N, N]
    h = jnp.dot(p, z.astype(p.dtype), preferred_element_type=jnp.float32)   # f32 [N, CP]

    # --- log_softmax over real classes: additive pad mask (0 valid / -1e30 pad) ---
    hm = h + mask_ref[...]                                 # one vadd; padded lanes -> -1e30
    m = jnp.max(hm, axis=1, keepdims=True)
    s = hm - m
    lse = jnp.log(jnp.sum(jnp.exp(s), axis=1, keepdims=True))  # exp of padded lanes underflows to 0
    o_ref[...] = (s - lse).astype(o_ref.dtype)             # lane-dense [N, CP] store


def net_forward(x_bf16, p_bf16, weights, biases, mask, *, num_classes):
    """Fused forward pass.
    x_bf16: bf16 [N, FP]; p_bf16: bf16 [N, N] precomputed propagation matrix;
    weights[i]: bf16 [Din, Dout] (lane-padded); biases[i]: f32 [1, Dout]; mask: f32 [1, CP]."""
    n = x_bf16.shape[0]
    num_layers = len(weights)
    cp = weights[-1].shape[1]                              # lane-padded class dim (multiple of 128)

    args = [x_bf16]
    for w_, b_ in zip(weights, biases):
        args += [w_, b_]
    args += [p_bf16, mask]

    # Advisory cost estimate (helps XLA overlap neighbors around this small latency-bound call).
    flops = 0
    din = x_bf16.shape[1]
    for w_ in weights:
        flops += 2 * n * din * w_.shape[1]
        din = w_.shape[1]
    flops += 2 * n * n * cp                                # P @ z
    bytes_accessed = (
        x_bf16.size * 2
        + sum(w_.size * 2 + b_.size * 4 for w_, b_ in zip(weights, biases))
        + p_bf16.size * 2 + mask.size * 4 + n * cp * 4
    )
    cost = pl.CostEstimate(flops=int(flops),
                           transcendentals=int(n * cp + n),
                           bytes_accessed=int(bytes_accessed))

    out_padded = pl.pallas_call(
        functools.partial(_net_fwd_kernel, num_layers=num_layers),
        out_shape=jax.ShapeDtypeStruct((n, cp), jnp.float32),
        in_specs=[pl.BlockSpec(memory_space=pltpu.MemorySpace.VMEM)] * len(args),
        out_specs=pl.BlockSpec(memory_space=pltpu.MemorySpace.VMEM),
        cost_estimate=cost,
    )(*args)
    # TODO(synk): downstream consumers that tolerate lane padding can use out_padded directly
    # and skip this lane-narrowing copy.
    return out_padded[:, :num_classes]


# ------------------------------- host-side glue (JAX) --------------------------------

def build_gcn_adj(edge_index, num_nodes):
    """Dense GCN-normalized adjacency: D^{-1/2} (A + I) D^{-1/2}.
    Duplicate edges coalesced and pre-existing self loops dropped before adding I
    (matches PyG gcn_norm / add_remaining_self_loops semantics on a simple graph)."""
    src, dst = edge_index[0], edge_index[1]
    a = jnp.zeros((num_nodes, num_nodes), jnp.float32).at[dst, src].add(1.0)
    a = jnp.minimum(a, 1.0)                                # coalesce multi-edges (unweighted graph)
    eye = jnp.eye(num_nodes, dtype=jnp.float32)
    a = a * (1.0 - eye) + eye                              # exactly one self loop per node
    deg = jnp.sum(a, axis=1)
    dinv = jnp.where(deg > 0.0, lax.rsqrt(deg), 0.0)
    return a * dinv[:, None] * dinv[None, :]


def build_prop_matrix(a_hat, k, alpha):
    """Precompute the full APPNP operator in f32 on the host (one-time cost for a static graph):
    P_0 = I;  P_{t+1} = (1-alpha) A_hat P_t + alpha I,  so that h_K = P_K @ z."""
    n = a_hat.shape[0]
    eye = jnp.eye(n, dtype=jnp.float32)
    p = eye
    for _ in range(k):
        p = (1.0 - alpha) * (a_hat @ p) + alpha * eye
    return p


def init_params(key, num_features, hiddens, num_classes):
    """torch.nn.Linear default init: U(-1/sqrt(fan_in), 1/sqrt(fan_in)).
    Weights stored transposed as [in, out] for x @ W."""
    dims = [num_features] + list(hiddens) + [num_classes]
    params = []
    for i in range(len(dims) - 1):
        fin, fout = dims[i], dims[i + 1]
        key, kw, kb = jax.random.split(key, 3)
        bound = 1.0 / jnp.sqrt(fin)
        w = jax.random.uniform(kw, (fin, fout), jnp.float32, -bound, bound)
        b = jax.random.uniform(kb, (1, fout), jnp.float32, -bound, bound)
        params.append((w, b))
    return params


def _round_up(v, m=128):
    return ((v + m - 1) // m) * m


def prepare_inputs(x, params):
    """Zero-pad feature / hidden / class dims to lane multiples of 128 and cast MXU operands to bf16.
    Zero-padded weight rows/cols and zero biases keep the math exact; padded class lanes are
    removed later by the log_softmax additive mask + wrapper slice."""
    fp = _round_up(x.shape[1])
    x_p = jnp.pad(x, ((0, 0), (0, fp - x.shape[1]))).astype(jnp.bfloat16)
    weights, biases = [], []
    din_p = fp
    for (w, b) in params:
        dout_p = _round_up(w.shape[1])
        w_p = jnp.zeros((din_p, dout_p), jnp.float32).at[:w.shape[0], :w.shape[1]].set(w)
        b_p = jnp.zeros((1, dout_p), jnp.float32).at[:, :w.shape[1]].set(b[0])
        weights.append(w_p.astype(jnp.bfloat16))
        biases.append(b_p)
        din_p = dout_p
    return x_p, weights, biases


def net_forward_ref(x_bf16, p_bf16, weights, biases, mask, *, num_classes):
    """Pure-JAX reference with identical bf16-operand / f32-accumulate math."""
    h = x_bf16
    for i in range(len(weights) - 1):
        h = jnp.dot(h, weights[i], preferred_element_type=jnp.float32) + biases[i]
        h = jnp.maximum(h, 0.0).astype(jnp.bfloat16)
    z = jnp.dot(h, weights[-1], preferred_element_type=jnp.float32) + biases[-1]
    h = jnp.dot(p_bf16, z.astype(jnp.bfloat16), preferred_element_type=jnp.float32)
    hm = h + mask
    out = jax.nn.log_softmax(hm, axis=1)
    return out[:, :num_classes]


def net_forward_f32(x, a_hat, params, *, k, alpha, num_classes):
    """Full-precision f32 reference of the original module (eval mode) for drift check."""
    h = x
    for i, (w, b) in enumerate(params):
        h = h @ w + b
        if i < len(params) - 1:
            h = jnp.maximum(h, 0.0)
    z = h
    h = z
    for _ in range(k):
        h = (1.0 - alpha) * (a_hat @ h) + alpha * z
    return jax.nn.log_softmax(h, axis=1)


# --------------------------------- driver -----------------------------------

if __name__ == "__main__":
    key = jax.random.PRNGKey(0)

    # Small synthetic graph / model sizes
    N = 128                # nodes
    NUM_FEATURES = 32
    HIDDENS = [64]
    NUM_CLASSES = 16
    E = 512                # directed edges before symmetrization
    K = 10
    ALPHA = 0.1
    DROPOUT = 0.5          # unused at inference (identity)

    key, kx, ke = jax.random.split(key, 3)
    x = jax.random.normal(kx, (N, NUM_FEATURES), jnp.float32)

    src = jax.random.randint(ke, (E,), 0, N)
    dst = jax.random.randint(jax.random.fold_in(ke, 1), (E,), 0, N)
    edge_index = jnp.stack(
        [jnp.concatenate([src, dst]), jnp.concatenate([dst, src])], axis=0
    )

    a_hat = build_gcn_adj(edge_index, N)
    p_mat = build_prop_matrix(a_hat, K, ALPHA)                  # f32 precompute (one-time)
    p_bf16 = p_mat.astype(jnp.bfloat16)                         # bf16 MXU operand (single quantization)

    params = init_params(key, NUM_FEATURES, HIDDENS, NUM_CLASSES)
    x_bf16, weights, biases = prepare_inputs(x, params)

    CP = weights[-1].shape[1]                                   # lane-padded class dim (128)
    mask = jnp.where(jnp.arange(CP) < NUM_CLASSES, 0.0, -1e30).astype(jnp.float32).reshape(1, CP)

    out = net_forward(x_bf16, p_bf16, weights, biases, mask, num_classes=NUM_CLASSES)
    out = jax.block_until_ready(out)

    assert out.shape == (N, NUM_CLASSES)
    # rows of log_softmax must exponentiate-sum to ~1
    row_sums = jnp.sum(jnp.exp(out), axis=1)
    assert bool(jnp.all(jnp.abs(row_sums - 1.0) < 1e-4)), "row sums off"

    # cross-check against pure-JAX reference with identical bf16/f32 math
    ref = net_forward_ref(x_bf16, p_bf16, weights, biases, mask, num_classes=NUM_CLASSES)
    assert bool(jnp.all(jnp.abs(out - ref) < 1e-2)), "mismatch vs same-precision reference"

    # loose drift check vs full-f32 reference of the original module (bf16 is only applied once now)
    ref32 = net_forward_f32(x, a_hat, params, k=K, alpha=ALPHA, num_classes=NUM_CLASSES)
    assert bool(jnp.all(jnp.abs(out - ref32) < 0.25)), "excessive drift vs f32 reference"

    print("KERNEL_OK")
</pallas_src>

<mosaic_0001>
module attributes {stable_mosaic.version = 11 : i64} {
  func.func @_net_fwd_kernel(%arg0: memref<128x128xbf16, #tpu.memory_space<vmem>>, %arg1: memref<128x128xbf16, #tpu.memory_space<vmem>>, %arg2: memref<1x128xf32, #tpu.memory_space<vmem>>, %arg3: memref<128x128xbf16, #tpu.memory_space<vmem>>, %arg4: memref<1x128xf32, #tpu.memory_space<vmem>>, %arg5: memref<128x128xbf16, #tpu.memory_space<vmem>>, %arg6: memref<1x128xf32, #tpu.memory_space<vmem>>, %arg7: memref<128x128xf32, #tpu.memory_space<vmem>>) attributes {dimension_semantics = [], scalar_prefetch = 0 : i64, scratch_operands = 0 : i64, tpu.core_type = #tpu.core_type<tc>} {
    %c0 = arith.constant 0 : index
    %c0_0 = arith.constant 0 : index
    %0 = vector.load %arg0[%c0, %c0_0] : memref<128x128xbf16, #tpu.memory_space<vmem>>, vector<128x128xbf16>
    %c0_1 = arith.constant 0 : index
    %c0_2 = arith.constant 0 : index
    %1 = vector.load %arg1[%c0_1, %c0_2] : memref<128x128xbf16, #tpu.memory_space<vmem>>, vector<128x128xbf16>
    %c0_3 = arith.constant 0 : index
    %c0_4 = arith.constant 0 : index
    %2 = vector.load %arg2[%c0_3, %c0_4] : memref<1x128xf32, #tpu.memory_space<vmem>>, vector<1x128xf32>
    %cst = arith.constant dense<0.000000e+00> : vector<128x128xf32>
    %3 = tpu.matmul %0, %1, %cst {dimension_numbers = #tpu.dot_dimension_numbers<[1], [0], [0], [1], [0, 0, 1, 1], [], []>} : vector<128x128xbf16>, vector<128x128xbf16>, vector<128x128xf32> -> vector<128x128xf32>
    %4 = vector.broadcast %2 : vector<1x128xf32> to vector<128x128xf32>
    %5 = arith.addf %3, %4 : vector<128x128xf32>
    %cst_5 = arith.constant 0.000000e+00 : f32
    %6 = vector.broadcast %cst_5 : f32 to vector<128x128xf32>
    %7 = arith.maximumf %5, %6 : vector<128x128xf32>
    %8 = arith.truncf %7 : vector<128x128xf32> to vector<128x128xbf16>
    %c0_6 = arith.constant 0 : index
    %c0_7 = arith.constant 0 : index
    %9 = vector.load %arg3[%c0_6, %c0_7] : memref<128x128xbf16, #tpu.memory_space<vmem>>, vector<128x128xbf16>
    %c0_8 = arith.constant 0 : index
    %c0_9 = arith.constant 0 : index
    %10 = vector.load %arg4[%c0_8, %c0_9] : memref<1x128xf32, #tpu.memory_space<vmem>>, vector<1x128xf32>
    %cst_10 = arith.constant dense<0.000000e+00> : vector<128x128xf32>
    %11 = tpu.matmul %8, %9, %cst_10 {dimension_numbers = #tpu.dot_dimension_numbers<[1], [0], [0], [1], [0, 0, 1, 1], [], []>} : vector<128x128xbf16>, vector<128x128xbf16>, vector<128x128xf32> -> vector<128x128xf32>
    %12 = vector.broadcast %10 : vector<1x128xf32> to vector<128x128xf32>
    %13 = arith.addf %11, %12 : vector<128x128xf32>
    %c0_11 = arith.constant 0 : index
    %c0_12 = arith.constant 0 : index
    %14 = vector.load %arg5[%c0_11, %c0_12] : memref<128x128xbf16, #tpu.memory_space<vmem>>, vector<128x128xbf16>
    %15 = arith.truncf %13 : vector<128x128xf32> to vector<128x128xbf16>
    %cst_13 = arith.constant dense<0.000000e+00> : vector<128x128xf32>
    %16 = tpu.matmul %14, %15, %cst_13 {dimension_numbers = #tpu.dot_dimension_numbers<[1], [0], [0], [1], [0, 0, 1, 1], [], []>} : vector<128x128xbf16>, vector<128x128xbf16>, vector<128x128xf32> -> vector<128x128xf32>
    %c0_14 = arith.constant 0 : index
    %c0_15 = arith.constant 0 : index
    %17 = vector.load %arg6[%c0_14, %c0_15] : memref<1x128xf32, #tpu.memory_space<vmem>>, vector<1x128xf32>
    %18 = vector.broadcast %17 : vector<1x128xf32> to vector<128x128xf32>
    %19 = arith.addf %16, %18 : vector<128x128xf32>
    %cst_16 = arith.constant dense<0xFF800000> : vector<128xf32>
    %20 = vector.multi_reduction <maximumf>, %19, %cst_16 [1] : vector<128x128xf32> to vector<128xf32>
    %21 = vector.shape_cast %20 : vector<128xf32> to vector<128x1xf32>
    %22 = vector.broadcast %21 : vector<128x1xf32> to vector<128x128xf32>
    %23 = arith.subf %19, %22 : vector<128x128xf32>
    %24 = math.exp %23 : vector<128x128xf32>
    %cst_17 = arith.constant dense<0.000000e+00> : vector<128xf32>
    %25 = vector.multi_reduction <add>, %24, %cst_17 [1] : vector<128x128xf32> to vector<128xf32>
    %26 = vector.shape_cast %25 : vector<128xf32> to vector<128x1xf32>
    %27 = math.log %26 : vector<128x1xf32>
    %28 = vector.broadcast %27 : vector<128x1xf32> to vector<128x128xf32>
    %29 = arith.subf %23, %28 : vector<128x128xf32>
    %c0_18 = arith.constant 0 : index
    %c0_19 = arith.constant 0 : index
    %30 = vector.load %arg7[%c0_18, %c0_19] : memref<128x128xf32, #tpu.memory_space<vmem>>, vector<128x128xf32>
    tpu.vector_store %arg7[%c0_18, %c0_19], %29 {strides = array<i32>} : memref<128x128xf32, #tpu.memory_space<vmem>>, vector<128x128xf32>,
    return
  }
}

</mosaic_0001>

<bundles_post_ra>
// kernel: tpu_custom_call.1
= control target key start
LH: loop header
LB: loop body
LE: loop exit
PB: predicated region body
PF: predicated region fallthrough
CT: control target
= control target key end

     0   :  { %12 = vsyncpa [#allocation3], 0  ;;  %s1299_s0 = inlined_call_operand.hbm [shape: bf16[128,128], index: 0, kind: input, shape index: {}]   ;;  %s1300_s1 = inlined_call_operand.hbm [shape: bf16[128,128], index: 1, kind: input, shape index: {}]   ;;  %s1301_s2 = inlined_call_operand.vmem [shape: f32[1,128], index: 2, kind: input, shape index: {}]   ;;  %s1302_s3 = inlined_call_operand.hbm [shape: bf16[128,128], index: 3, kind: input, shape index: {}]   ;;  %s1303_s4 = inlined_call_operand.vmem [shape: f32[1,128], index: 4, kind: input, shape index: {}]   ;;  %s1304_s5 = inlined_call_operand.hbm [shape: bf16[128,128], index: 5, kind: input, shape index: {}]   ;;  %s1305_s6 = inlined_call_operand.vmem [shape: f32[1,128], index: 6, kind: input, shape index: {}]   ;;  %s1306_s7 = inlined_call_operand.hbm [shape: f32[128,128], index: 7, kind: output, shape index: {}]  }
   0x1   :  { %13 = vsyncpa [#allocation6], 0 }
   0x2   :  { %14 = vsyncpa [#allocation9], 0 }
   0x3   :  { %15 = vsyncpa [#allocation4], 0  ;;  %s33_s26 = sshll.u32 %s1300_s1, 4  ;;  %s1122_s27 = smov [#allocation5]   ;;  %s34_s26 = int_to_ptr.hbm [resolvable:$true] %s33_s26 }
   0x4   :  { %s35_s28 = sshll.u32 %s1122_s27, 4  ;;  %s20_s8 = sshll.u32 %s1299_s0, 4  ;;  %s36_s28 = int_to_ptr.vmem [resolvable:$true] %s35_s28  ;;  %s21_s8 = int_to_ptr.hbm [resolvable:$true] %s20_s8 }
   0x5   :  { %s1123_s9 = smov 64   ;;  %s1124_s10 = smov 4  }
   0x6   :  { %41 = dma.hbm_to_vmem [thread:$0]  %s34_s26, 1024, %s36_s28, [#allocation6], %s1123_s9, %s1123_s9, %s1124_s10  }
   0x7   :  { %s1125_s11 = smov [#allocation2]   ;;  %s48_s15 = sshll.u32 %s1302_s3, 4  ;;  %s49_s15 = int_to_ptr.hbm [resolvable:$true] %s48_s15 }
   0x8   :  { %s22_s12 = sshll.u32 %s1125_s11, 4  ;;  %s63_s17 = sshll.u32 %s1304_s5, 4  ;;  %s23_s12 = int_to_ptr.vmem [resolvable:$true] %s22_s12  ;;  %s64_s17 = int_to_ptr.hbm [resolvable:$true] %s63_s17 }
   0x9   :  { %28 = dma.hbm_to_vmem [thread:$0]  %s21_s8, 1024, %s23_s12, [#allocation3], %s1123_s9, %s1123_s9, %s1124_s10  }
   0xa   :  { %s1126_s18 = smov [#allocation7]   ;;  %s1127_s0 = smov [#allocation8]  }
   0xb   :  { %s50_s19 = sshll.u32 %s1126_s18, 4  ;;  %s65_s20 = sshll.u32 %s1127_s0, 4  ;;  %s51_s19 = int_to_ptr.vmem [resolvable:$true] %s50_s19  ;;  %s66_s20 = int_to_ptr.vmem [resolvable:$true] %s65_s20 }
   0xc   :  { %56 = dma.hbm_to_vmem [thread:$0]  %s49_s15, 1024, %s51_s19, [#allocation6], %s1123_s9, %s1123_s9, %s1124_s10  }
   0xd   :  { %71 = dma.hbm_to_vmem [thread:$0]  %s64_s17, 1024, %s66_s20, [#allocation9], %s1123_s9, %s1123_s9, %s1124_s10  }
   0xe   :  { %1114 = dma.done.wait [#allocation3], 1024  }
   0xf   :  { %1115 = vsyncadd [#allocation3], 4294966272 }
  0x10   :  { %1116 = dma.done.wait [#allocation6], 2048  }
  0x11   :  { %1117 = vsyncadd [#allocation6], 4294965248 }
  0x12   :  { %1118 = dma.done.wait [#allocation9], 1024  }
  0x13   :  { %1119 = vsyncadd [#allocation9], 4294966272  ;;  %v877_v0 = vld [vmem:[#allocation5 + $0x38] sm:$0xff]  ;;  %v876_v1 = vld [vmem:[#allocation5 + $0x30] sm:$0xff]  ;;  %s719_s26 = sshll.u32 %s1306_s7, 4  ;;  %s1129_s27 = smov 128   ;;  %s720_s26 = int_to_ptr.hbm [resolvable:$true] %s719_s26 }
  0x14   :  { %222 = vmatpush.bf16.msra.mxu0 %v877_v0  ;;  %894 = vmatpush.bf16.msra.mxu3 %v877_v0  ;;  %v875_v2 = vld [vmem:[#allocation5 + $0x28] sm:$0xff]  ;;  %v874_v3 = vld [vmem:[#allocation5 + $0x20] sm:$0xff]  ;;  %v873_v4 = vld [vmem:[#allocation5 + $0x18] sm:$0xff]  ;;  %s1130_s28 = smov 8  }
  0x15   :  { %v872_v5 = vld [vmem:[#allocation5 + $0x10] sm:$0xff]  ;;  %v871_v6 = vld [vmem:[#allocation5 + $0x8] sm:$0xff]  ;;  %v870_v7 = vld [vmem:[#allocation5] sm:$0xff] }
  0x16   :  { %v862_v8 = vld [vmem:[#allocation2] sm:$0xff]  ;;  %v868_v9 = vld [vmem:[#allocation2 + $0x30] sm:$0xff]  ;;  %v863_v10 = vld [vmem:[#allocation2 + $0x8] sm:$0xff] }
  0x17   :  { %v869_v11 = vld [vmem:[#allocation2 + $0x38] sm:$0xff]  ;;  %v864_v12 = vld [vmem:[#allocation2 + $0x10] sm:$0xff]  ;;  %v883_v16 = vld [vmem:[#allocation7 + $0x28] sm:$0xff] }
  0x18   :  { %223 = vmatpush.bf16.msra.mxu0 %v876_v1  ;;  %895 = vmatpush.bf16.msra.mxu3 %v876_v1  ;;  %v865_v13 = vld [vmem:[#allocation2 + $0x18] sm:$0xff]  ;;  %v884_v15 = vld [vmem:[#allocation7 + $0x30] sm:$0xff]  ;;  %v882_v17 = vld [vmem:[#allocation7 + $0x20] sm:$0xff] }
  0x19   :  { %v885_v14 = vld [vmem:[#allocation7 + $0x38] sm:$0xff]  ;;  %v866_v18 = vld [vmem:[#allocation2 + $0x20] sm:$0xff]  ;;  %v867_v19 = vld [vmem:[#allocation2 + $0x28] sm:$0xff] }
  0x1a   :  { %363 = vmatpush.bf16.msra.mxu1 %v885_v14  ;;  %v881_v20 = vld [vmem:[#allocation7 + $0x18] sm:$0xff]  ;;  %v880_v21 = vld [vmem:[#allocation7 + $0x10] sm:$0xff]  ;;  %v879_v22 = vld [vmem:[#allocation7 + $0x8] sm:$0xff] }
  0x1b   :  { %v878_v23 = vld [vmem:[#allocation7] sm:$0xff] }
  0x1c   :  { %224 = vmatpush.bf16.msra.mxu0 %v875_v2  ;;  %896 = vmatpush.bf16.msra.mxu3 %v875_v2  ;;  %v927_v25 = vld [vmem:[%s1301_s2] ss:$0 sm:$0xff] }
  0x1e   :  { %364 = vmatpush.bf16.msra.mxu1 %v884_v15 }
  0x20   :  { %225 = vmatpush.bf16.msra.mxu0 %v874_v3  ;;  %897 = vmatpush.bf16.msra.mxu3 %v874_v3 }
  0x22   :  { %365 = vmatpush.bf16.msra.mxu1 %v883_v16 }
  0x24   :  { %226 = vmatpush.bf16.msra.mxu0 %v873_v4  ;;  %898 = vmatpush.bf16.msra.mxu3 %v873_v4 }
  0x26   :  { %366 = vmatpush.bf16.msra.mxu1 %v882_v17 }
  0x28   :  { %227 = vmatpush.bf16.msra.mxu0 %v872_v5  ;;  %899 = vmatpush.bf16.msra.mxu3 %v872_v5 }
  0x2a   :  { %367 = vmatpush.bf16.msra.mxu1 %v881_v20 }
  0x2c   :  { %228 = vmatpush.bf16.msra.mxu0 %v871_v6  ;;  %900 = vmatpush.bf16.msra.mxu3 %v871_v6 }
  0x2e   :  { %368 = vmatpush.bf16.msra.mxu1 %v880_v21 }
  0x30   :  { %229 = vmatpush.bf16.msra.mxu0 %v870_v7  ;;  %901 = vmatpush.bf16.msra.mxu3 %v870_v7 }
  0x32   :  { %369 = vmatpush.bf16.msra.mxu1 %v879_v22 }
  0x33   :  { %230 = vmatmul.bf16.vlgmr.msra.gmra.mxu0 %v862_v8  ;;  %260 = vmatmul.bf16.vlgmr.msra.gmra.mxu3 %v868_v9 }
  0x34   :  { %902 = vmatpush.bf16.msrb.mxu3 %v885_v14 }
  0x36   :  { %370 = vmatpush.bf16.msra.mxu1 %v878_v23 }
  0x38   :  { %903 = vmatpush.bf16.msrb.mxu3 %v884_v15 }
  0x3c   :  { %904 = vmatpush.bf16.msrb.mxu3 %v883_v16 }
  0x40   :  { %905 = vmatpush.bf16.msrb.mxu3 %v882_v17 }
  0x43   :  { %235 = vmatmul.bf16.gmra.mxu0 %v863_v10  ;;  %265 = vmatmul.bf16.gmra.mxu3 %v869_v11 }
  0x44   :  { %906 = vmatpush.bf16.msrb.mxu3 %v881_v20 }
  0x48   :  { %907 = vmatpush.bf16.msrb.mxu3 %v880_v21 }
  0x4c   :  { %908 = vmatpush.bf16.msrb.mxu3 %v879_v22 }
  0x50   :  { %909 = vmatpush.bf16.msrb.mxu3 %v878_v23 }
  0x53   :  { %240 = vmatmul.bf16.gmra.mxu0 %v864_v12 }
  0x63   :  { %245 = vmatmul.bf16.gmra.mxu0 %v865_v13 }
  0x73   :  { %250 = vmatmul.bf16.gmra.mxu0 %v866_v18  ;;  %v928_v18 = vld [vmem:[%s1303_s4] ss:$0 sm:$0xff] }
  0x83   :  { %255 = vmatmul.bf16.gmra.mxu0 %v867_v19 }
  0xb0   :  { %v231_v24 = vpop.f32.mrf.mxu0 }
  0xb1   :  { %v232_v27 = vadd.f32 %v927_v25, %v231_v24 }
  0xb3   :  { %v271_v30 = vmax.f32 %v232_v27, 0.0 }
  0xb6   :  { %v261_v26 = vpop.f32.mrf.mxu3 }
  0xb7   :  { %v262_v32 = vadd.f32 %v927_v25, %v261_v26 }
  0xb8   :  { %v233_v28 = vpop.f32.mrf.mxu0 }
  0xb9   :  { %v234_v29 = vadd.f32 %v927_v25, %v233_v28  ;;  %v283_v35 = vmax.f32 %v262_v32, 0.0 }
  0xbb   :  { %v272_v31 = vmax.f32 %v234_v29, 0.0 }
  0xbd   :  { %v287_v33 = vpack.c.bf16 %v272_v31, %v271_v30 }
  0xbe   :  { %v263_v34 = vpop.f32.mrf.mxu3 }
  0xbf   :  { %371 = vmatmul.bf16.vlgmr.msra.gmra.mxu1 %v287_v33  ;;  %v264_v36 = vadd.f32 %v927_v25, %v263_v34 }
  0xc0   :  { %v236_v37 = vpop.f32.mrf.mxu0 }
  0xc1   :  { %v284_v38 = vmax.f32 %v264_v36, 0.0  ;;  %v237_v41 = vadd.f32 %v927_v25, %v236_v37 }
  0xc3   :  { %v293_v39 = vpack.c.bf16 %v284_v38, %v283_v35  ;;  %v273_v44 = vmax.f32 %v237_v41, 0.0 }
  0xc5   :  { %401 = vmatmul.bf16.vlgmr.msrb.gmra.mxu3 %v293_v39 }
  0xc6   :  { %v266_v40 = vpop.f32.mrf.mxu3 }
  0xc7   :  { %v267_v46 = vadd.f32 %v927_v25, %v266_v40 }
  0xc8   :  { %v238_v42 = vpop.f32.mrf.mxu0 }
  0xc9   :  { %v239_v43 = vadd.f32 %v927_v25, %v238_v42  ;;  %v285_v49 = vmax.f32 %v267_v46, 0.0 }
  0xcb   :  { %v274_v45 = vmax.f32 %v239_v43, 0.0 }
  0xcd   :  { %v288_v47 = vpack.c.bf16 %v274_v45, %v273_v44 }
  0xce   :  { %v268_v48 = vpop.f32.mrf.mxu3 }
  0xcf   :  { %376 = vmatmul.bf16.gmra.mxu1 %v288_v47  ;;  %v269_v50 = vadd.f32 %v927_v25, %v268_v48 }
  0xd0   :  { %v241_v51 = vpop.f32.mrf.mxu0 }
  0xd1   :  { %v286_v52 = vmax.f32 %v269_v50, 0.0  ;;  %v242_v54 = vadd.f32 %v927_v25, %v241_v51 }
  0xd3   :  { %v294_v53 = vpack.c.bf16 %v286_v52, %v285_v49  ;;  %v275_v57 = vmax.f32 %v242_v54, 0.0 }
  0xd5   :  { %406 = vmatmul.bf16.gmra.mxu3 %v294_v53 }
  0xd8   :  { %v243_v55 = vpop.f32.mrf.mxu0 }
  0xd9   :  { %v244_v56 = vadd.f32 %v927_v25, %v243_v55 }
  0xdb   :  { %v276_v58 = vmax.f32 %v244_v56, 0.0 }
  0xdd   :  { %v289_v59 = vpack.c.bf16 %v276_v58, %v275_v57  ;;  %v886_v58 = vld [vmem:[#allocation8] sm:$0xff] }
  0xdf   :  { %381 = vmatmul.bf16.gmra.mxu1 %v289_v59  ;;  %v892_v59 = vld [vmem:[#allocation8 + $0x30] sm:$0xff] }
  0xe0   :  { %v246_v60 = vpop.f32.mrf.mxu0 }
  0xe1   :  { %v247_v61 = vadd.f32 %v927_v25, %v246_v60  ;;  %v887_v60 = vld [vmem:[#allocation8 + $0x8] sm:$0xff] }
  0xe3   :  { %v277_v0 = vmax.f32 %v247_v61, 0.0  ;;  %v888_v61 = vld [vmem:[#allocation8 + $0x10] sm:$0xff] }
  0xe8   :  { %v248_v62 = vpop.f32.mrf.mxu0 }
  0xe9   :  { %v249_v63 = vadd.f32 %v927_v25, %v248_v62  ;;  %v893_v62 = vld [vmem:[#allocation8 + $0x38] sm:$0xff] }
  0xeb   :  { %v278_v1 = vmax.f32 %v249_v63, 0.0  ;;  %v889_v63 = vld [vmem:[#allocation8 + $0x18] sm:$0xff] }
  0xed   :  { %v290_v2 = vpack.c.bf16 %v278_v1, %v277_v0  ;;  %v890_v0 = vld [vmem:[#allocation8 + $0x20] sm:$0xff]  ;;  %v891_v1 = vld [vmem:[#allocation8 + $0x28] sm:$0xff] }
  0xef   :  { %386 = vmatmul.bf16.gmra.mxu1 %v290_v2  ;;  %v929_v2 = vld [vmem:[%s1305_s6] ss:$0 sm:$0xff]  ;;  %s1128_s6 = smov [#allocation10]  }
  0xf0   :  { %v251_v3 = vpop.f32.mrf.mxu0  ;;  %s717_s23 = sshll.u32 %s1128_s6, 4  ;;  %s718_s23 = int_to_ptr.vmem [resolvable:$true] %s717_s23 }
  0xf1   :  { %v252_v4 = vadd.f32 %v927_v25, %v251_v3 }
  0xf3   :  { %v279_v7 = vmax.f32 %v252_v4, 0.0 }
  0xf8   :  { %v253_v5 = vpop.f32.mrf.mxu0 }
  0xf9   :  { %v254_v6 = vadd.f32 %v927_v25, %v253_v5 }
  0xfb   :  { %v280_v8 = vmax.f32 %v254_v6, 0.0 }
  0xfd   :  { %v291_v9 = vpack.c.bf16 %v280_v8, %v279_v7 }
  0xff   :  { %391 = vmatmul.bf16.gmra.mxu1 %v291_v9 }
 0x100   :  { %v256_v10 = vpop.f32.mrf.mxu0 }
 0x101   :  { %v257_v11 = vadd.f32 %v927_v25, %v256_v10 }
 0x103   :  { %v281_v14 = vmax.f32 %v257_v11, 0.0 }
 0x108   :  { %v258_v12 = vpop.f32.mrf.mxu0 }
 0x109   :  { %v259_v13 = vadd.f32 %v927_v25, %v258_v12 }
 0x10b   :  { %v282_v15 = vmax.f32 %v259_v13, 0.0 }
 0x10d   :  { %v292_v16 = vpack.c.bf16 %v282_v15, %v281_v14 }
 0x10f   :  { %396 = vmatmul.bf16.gmra.mxu1 %v292_v16 }
 0x13c   :  { %v372_v17 = vpop.f32.mrf.mxu1 }
 0x13d   :  { %v373_v20 = vadd.f32 %v928_v18, %v372_v17 }
 0x144   :  { %v374_v19 = vpop.f32.mrf.mxu1 }
 0x145   :  { %v375_v21 = vadd.f32 %v928_v18, %v374_v19 }
 0x147   :  { %v428_v22 = vpack.c.bf16 %v375_v21, %v373_v20 }
 0x148   :  { %v402_v23 = vpop.f32.mrf.mxu3 }
 0x149   :  { %v403_v34 = vadd.f32 %v928_v18, %v402_v23 }
 0x14c   :  { %v377_v24 = vpop.f32.mrf.mxu1 }
 0x14d   :  { %v378_v28 = vadd.f32 %v928_v18, %v377_v24 }
 0x150   :  { %v404_v26 = vpop.f32.mrf.mxu3 }
 0x151   :  { %v405_v35 = vadd.f32 %v928_v18, %v404_v26 }
 0x153   :  { %v434_v39 = vpack.c.bf16 %v405_v35, %v403_v34 }
 0x154   :  { %v379_v27 = vpop.f32.mrf.mxu1 }
 0x155   :  { %v380_v29 = vadd.f32 %v928_v18, %v379_v27 }
 0x157   :  { %v429_v25 = vpack.c.bf16 %v380_v29, %v378_v28 }
 0x158   :  { %v407_v30 = vpop.f32.mrf.mxu3 }
 0x159   :  { %v408_v32 = vadd.f32 %v928_v18, %v407_v30 }
 0x15c   :  { %v382_v31 = vpop.f32.mrf.mxu1 }
 0x15d   :  { %v383_v56 = vadd.f32 %v928_v18, %v382_v31 }
 0x160   :  { %v409_v33 = vpop.f32.mrf.mxu3 }
 0x161   :  { %v410_v36 = vadd.f32 %v928_v18, %v409_v33 }
 0x163   :  { %v435_v37 = vpack.c.bf16 %v410_v36, %v408_v32 }
 0x164   :  { %v384_v38 = vpop.f32.mrf.mxu1 }
 0x165   :  { %488 = vmatpush.bf16.msra.mxu2 %v435_v37  ;;  %910 = vmatpush.bf16.msra.mxu3 %v435_v37  ;;  %v385_v54 = vadd.f32 %v928_v18, %v384_v38 }
 0x167   :  { %v430_v57 = vpack.c.bf16 %v385_v54, %v383_v56 }
 0x169   :  { %489 = vmatpush.bf16.msra.mxu2 %v434_v39  ;;  %911 = vmatpush.bf16.msra.mxu3 %v434_v39 }
 0x16c   :  { %v387_v40 = vpop.f32.mrf.mxu1 }
 0x16d   :  { %v388_v53 = vadd.f32 %v928_v18, %v387_v40 }
 0x174   :  { %v389_v41 = vpop.f32.mrf.mxu1 }
 0x175   :  { %v390_v51 = vadd.f32 %v928_v18, %v389_v41 }
 0x177   :  { %v431_v55 = vpack.c.bf16 %v390_v51, %v388_v53 }
 0x17c   :  { %v392_v42 = vpop.f32.mrf.mxu1 }
 0x17d   :  { %v393_v50 = vadd.f32 %v928_v18, %v392_v42 }
 0x184   :  { %v394_v43 = vpop.f32.mrf.mxu1 }
 0x185   :  { %v395_v48 = vadd.f32 %v928_v18, %v394_v43 }
 0x187   :  { %v432_v52 = vpack.c.bf16 %v395_v48, %v393_v50 }
 0x18c   :  { %v397_v44 = vpop.f32.mrf.mxu1 }
 0x18d   :  { %v398_v46 = vadd.f32 %v928_v18, %v397_v44 }
 0x194   :  { %v399_v45 = vpop.f32.mrf.mxu1 }
 0x195   :  { %v400_v47 = vadd.f32 %v928_v18, %v399_v45 }
 0x197   :  { %v433_v49 = vpack.c.bf16 %v400_v47, %v398_v46 }
 0x199   :  { %490 = vmatpush.bf16.msra.mxu2 %v433_v49  ;;  %912 = vmatpush.bf16.msra.mxu3 %v433_v49 }
 0x19d   :  { %491 = vmatpush.bf16.msra.mxu2 %v432_v52  ;;  %913 = vmatpush.bf16.msra.mxu3 %v432_v52 }
 0x1a1   :  { %492 = vmatpush.bf16.msra.mxu2 %v431_v55  ;;  %914 = vmatpush.bf16.msra.mxu3 %v431_v55 }
 0x1a5   :  { %493 = vmatpush.bf16.msra.mxu2 %v430_v57  ;;  %915 = vmatpush.bf16.msra.mxu3 %v430_v57 }
 0x1a9   :  { %494 = vmatpush.bf16.msra.mxu2 %v429_v25  ;;  %916 = vmatpush.bf16.msra.mxu3 %v429_v25 }
 0x1ad   :  { %495 = vmatpush.bf16.msra.mxu2 %v428_v22  ;;  %917 = vmatpush.bf16.msra.mxu3 %v428_v22 }
 0x1b0   :  { %496 = vmatmul.bf16.vlgmr.msra.gmra.mxu2 %v886_v58  ;;  %526 = vmatmul.bf16.vlgmr.msra.gmra.mxu3 %v892_v59 }
 0x1c0   :  { %501 = vmatmul.bf16.gmra.mxu2 %v887_v60  ;;  %531 = vmatmul.bf16.gmra.mxu3 %v893_v62 }
 0x1d0   :  { %506 = vmatmul.bf16.gmra.mxu2 %v888_v61 }
 0x1e0   :  { %511 = vmatmul.bf16.gmra.mxu2 %v889_v63 }
 0x1f0   :  { %516 = vmatmul.bf16.gmra.mxu2 %v890_v0 }
 0x200   :  { %521 = vmatmul.bf16.gmra.mxu2 %v891_v1 }
 0x233   :  { %v497_v3 = vpop.f32.mrf.mxu2  ;;  %v527_v5 = vpop.f32.mrf.mxu3 }
 0x234   :  { %v498_v4 = vadd.f32 %v929_v2, %v497_v3  ;;  %v528_v6 = vadd.f32 %v929_v2, %v527_v5 }
 0x236   :  { %537 = vmax.xlane.f32.xlu0 %v498_v4 }
 0x23b   :  { %v499_v7 = vpop.f32.mrf.mxu2  ;;  %v529_v21 = vpop.f32.mrf.mxu3 }
 0x23c   :  { %v500_v9 = vadd.f32 %v929_v2, %v499_v7  ;;  %v1213_v32 = vadd.f32 %v929_v2, %v529_v21 }
 0x23e   :  { %561 = vmax.xlane.f32.xlu0 %v528_v6 }
 0x243   :  { %v502_v8 = vpop.f32.mrf.mxu2  ;;  %v532_v24 = vpop.f32.mrf.mxu3 }
 0x244   :  { %v503_v10 = vadd.f32 %v929_v2, %v502_v8  ;;  %v1219_v34 = vadd.f32 %v929_v2, %v532_v24 }
 0x246   :  { %541 = vmax.xlane.f32.xlu1 %v503_v10  ;;  %539 = vmax.xlane.f32.xlu0 %v500_v9 }
 0x24b   :  { %v504_v11 = vpop.f32.mrf.mxu2  ;;  %v534_v28 = vpop.f32.mrf.mxu3 }
 0x24c   :  { %v505_v12 = vadd.f32 %v929_v2, %v504_v11  ;;  %v1207_v29 = vadd.f32 %v929_v2, %v534_v28 }
 0x24e   :  { %543 = vmax.xlane.f32.xlu1 %v505_v12 }
 0x253   :  { %v507_v13 = vpop.f32.mrf.mxu2 }
 0x254   :  { %v508_v14 = vadd.f32 %v929_v2, %v507_v13 }
 0x256   :  { %545 = vmax.xlane.f32.xlu2 %v508_v14 }
 0x25b   :  { %v509_v15 = vpop.f32.mrf.mxu2 }
 0x25c   :  { %v1192_v16 = vadd.f32 %v929_v2, %v509_v15 }
 0x25e   :  { %547 = vmax.xlane.f32.xlu2 %v1192_v16 }
 0x263   :  { %v512_v17 = vpop.f32.mrf.mxu2 }
 0x264   :  { %v1195_v18 = vadd.f32 %v929_v2, %v512_v17 }
 0x266   :  { %549 = vmax.xlane.f32.xlu0 %v1195_v18 }
 0x26b   :  { %v514_v19 = vpop.f32.mrf.mxu2 }
 0x26c   :  { %v1198_v20 = vadd.f32 %v929_v2, %v514_v19 }
 0x26e   :  { %551 = vmax.xlane.f32.xlu1 %v1198_v20 }
 0x273   :  { %v517_v22 = vpop.f32.mrf.mxu2 }
 0x274   :  { %v1201_v23 = vadd.f32 %v929_v2, %v517_v22 }
 0x276   :  { %553 = vmax.xlane.f32.xlu2 %v1201_v23 }
 0x27b   :  { %v519_v26 = vpop.f32.mrf.mxu2 }
 0x27c   :  { %v1204_v27 = vadd.f32 %v929_v2, %v519_v26 }
 0x27e   :  { %555 = vmax.xlane.f32.xlu0 %v1204_v27 }
 0x283   :  { %v522_v25 = vpop.f32.mrf.mxu2 }
 0x284   :  { %v1209_v30 = vadd.f32 %v929_v2, %v522_v25 }
 0x286   :  { %557 = vmax.xlane.f32.xlu1 %v1209_v30  ;;  %567 = vmax.xlane.f32.xlu0 %v1207_v29 }
 0x28b   :  { %v524_v31 = vpop.f32.mrf.mxu2 }
 0x28c   :  { %v1215_v33 = vadd.f32 %v929_v2, %v524_v31 }
 0x28e   :  { %559 = vmax.xlane.f32.xlu2 %v1215_v33  ;;  %563 = vmax.xlane.f32.xlu1 %v1213_v32 }
 0x296   :  { %565 = vmax.xlane.f32.xlu2 %v1219_v34 }
 0x2a9   :  { %v538_v35 = vpop.xlane.xlu0 %537 }
 0x2aa   :  { %v1222_v36 = vsub.f32 %v498_v4, %v538_v35 }
 0x2ac   :  { %v585_v37 = vmul.f32 1.442695, %v1222_v36 }
 0x2ae   :  { %930 = vpow2.f32 %v585_v37 }
 0x2b1   :  { %v562_v38 = vpop.xlane.xlu0 %561 }
 0x2b2   :  { %v1225_v39 = vsub.f32 %v528_v6, %v562_v38 }
 0x2b4   :  { %v931_v40 = vpop.eup %930  ;;  %v609_v41 = vmul.f32 1.442695, %v1225_v39 }
 0x2b5   :  { %617 = vadd.xlane.f32.xlu1 %v931_v40 }
 0x2b6   :  { %932 = vpow2.f32 %v609_v41 }
 0x2b9   :  { %v542_v42 = vpop.xlane.xlu1 %541  ;;  %v540_v43 = vpop.xlane.xlu0 %539 }
 0x2ba   :  { %v1228_v44 = vsub.f32 %v503_v10, %v542_v42  ;;  %v1230_v45 = vsub.f32 %v500_v9, %v540_v43 }
 0x2bc   :  { %v933_v46 = vpop.eup %932  ;;  %v589_v47 = vmul.f32 1.442695, %v1228_v44  ;;  %v587_v48 = vmul.f32 1.442695, %v1230_v45 }
 0x2bd   :  { %641 = vadd.xlane.f32.xlu1 %v933_v46 }
 0x2be   :  { %934 = vpow2.f32 %v589_v47 }
 0x2bf   :  { %936 = vpow2.f32 %v587_v48 }
 0x2c1   :  { %v544_v49 = vpop.xlane.xlu1 %543 }
 0x2c2   :  { %v1234_v50 = vsub.f32 %v505_v12, %v544_v49 }
 0x2c4   :  { %v935_v51 = vpop.eup %934  ;;  %v591_v52 = vmul.f32 1.442695, %v1234_v50 }
 0x2c5   :  { %v937_v53 = vpop.eup %936  ;;  %621 = vadd.xlane.f32.xlu0 %v935_v51 }
 0x2c6   :  { %938 = vpow2.f32 %v591_v52  ;;  %619 = vadd.xlane.f32.xlu2 %v937_v53 }
 0x2c9   :  { %v546_v54 = vpop.xlane.xlu2 %545 }
 0x2ca   :  { %v1237_v55 = vsub.f32 %v508_v14, %v546_v54 }
 0x2cc   :  { %v939_v56 = vpop.eup %938  ;;  %v593_v57 = vmul.f32 1.442695, %v1237_v55 }
 0x2cd   :  { %623 = vadd.xlane.f32.xlu1 %v939_v56 }
 0x2ce   :  { %940 = vpow2.f32 %v593_v57 }
 0x2d1   :  { %v548_v58 = vpop.xlane.xlu2 %547 }
 0x2d2   :  { %v1241_v59 = vsub.f32 %v1192_v16, %v548_v58 }
 0x2d4   :  { %v941_v60 = vpop.eup %940  ;;  %v595_v61 = vmul.f32 1.442695, %v1241_v59 }
 0x2d5   :  { %625 = vadd.xlane.f32.xlu2 %v941_v60 }
 0x2d6   :  { %942 = vpow2.f32 %v595_v61 }
 0x2d9   :  { %v550_v62 = vpop.xlane.xlu0 %549 }
 0x2da   :  { %v1245_v63 = vsub.f32 %v1195_v18, %v550_v62 }
 0x2dc   :  { %v943_v0 = vpop.eup %942  ;;  %v597_v1 = vmul.f32 1.442695, %v1245_v63 }
 0x2dd   :  { %627 = vadd.xlane.f32.xlu0 %v943_v0 }
 0x2de   :  { %944 = vpow2.f32 %v597_v1 }
 0x2e1   :  { %v552_v2 = vpop.xlane.xlu1 %551 }
 0x2e2   :  { %v1249_v3 = vsub.f32 %v1198_v20, %v552_v2 }
 0x2e4   :  { %v945_v4 = vpop.eup %944  ;;  %v599_v5 = vmul.f32 1.442695, %v1249_v3 }
 0x2e5   :  { %629 = vadd.xlane.f32.xlu1 %v945_v4 }
 0x2e6   :  { %946 = vpow2.f32 %v599_v5 }
 0x2e9   :  { %v554_v6 = vpop.xlane.xlu2 %553 }
 0x2ea   :  { %v1253_v7 = vsub.f32 %v1201_v23, %v554_v6 }
 0x2ec   :  { %v947_v8 = vpop.eup %946  ;;  %v601_v9 = vmul.f32 1.442695, %v1253_v7 }
 0x2ed   :  { %631 = vadd.xlane.f32.xlu2 %v947_v8 }
 0x2ee   :  { %948 = vpow2.f32 %v601_v9 }
 0x2f1   :  { %v556_v10 = vpop.xlane.xlu0 %555 }
 0x2f2   :  { %v1257_v11 = vsub.f32 %v1204_v27, %v556_v10 }
 0x2f4   :  { %v949_v12 = vpop.eup %948  ;;  %v603_v13 = vmul.f32 1.442695, %v1257_v11 }
 0x2f5   :  { %633 = vadd.xlane.f32.xlu0 %v949_v12 }
 0x2f6   :  { %950 = vpow2.f32 %v603_v13 }
 0x2f9   :  { %v558_v14 = vpop.xlane.xlu1 %557  ;;  %v568_v15 = vpop.xlane.xlu0 %567 }
 0x2fa   :  { %v1261_v16 = vsub.f32 %v1209_v30, %v558_v14  ;;  %v1264_v17 = vsub.f32 %v1207_v29, %v568_v15 }
 0x2fc   :  { %v951_v18 = vpop.eup %950  ;;  %v605_v19 = vmul.f32 1.442695, %v1261_v16  ;;  %v615_v20 = vmul.f32 1.442695, %v1264_v17 }
 0x2fd   :  { %635 = vadd.xlane.f32.xlu1 %v951_v18 }
 0x2fe   :  { %952 = vpow2.f32 %v605_v19 }
 0x2ff   :  { %954 = vpow2.f32 %v615_v20 }
 0x301   :  { %v560_v21 = vpop.xlane.xlu2 %559  ;;  %v564_v22 = vpop.xlane.xlu1 %563 }
 0x302   :  { %v1269_v23 = vsub.f32 %v1215_v33, %v560_v21  ;;  %v1272_v24 = vsub.f32 %v1213_v32, %v564_v22 }
 0x304   :  { %v953_v26 = vpop.eup %952  ;;  %v607_v27 = vmul.f32 1.442695, %v1269_v23  ;;  %v611_v28 = vmul.f32 1.442695, %v1272_v24 }
 0x305   :  { %v955_v29 = vpop.eup %954  ;;  %637 = vadd.xlane.f32.xlu2 %v953_v26 }
 0x306   :  { %956 = vpow2.f32 %v607_v27  ;;  %647 = vadd.xlane.f32.xlu1 %v955_v29 }
 0x307   :  { %958 = vpow2.f32 %v611_v28 }
 0x309   :  { %v566_v25 = vpop.xlane.xlu2 %565 }
 0x30a   :  { %v1277_v30 = vsub.f32 %v1219_v34, %v566_v25 }
 0x30c   :  { %v957_v31 = vpop.eup %956  ;;  %v613_v33 = vmul.f32 1.442695, %v1277_v30 }
 0x30d   :  { %v959_v35 = vpop.eup %958  ;;  %639 = vadd.xlane.f32.xlu0 %v957_v31 }
 0x30e   :  { %960 = vpow2.f32 %v613_v33  ;;  %643 = vadd.xlane.f32.xlu2 %v959_v35 }
 0x314   :  { %v961_v32 = vpop.eup %960 }
 0x315   :  { %645 = vadd.xlane.f32.xlu0 %v961_v32 }
 0x328   :  { %v618_v37 = vpop.xlane.xlu1 %617 }
 0x329   :  { %962 = vlog2.f32 %v618_v37 }
 0x32f   :  { %v963_v38 = vpop.eup %962 }
 0x330   :  { %v650_v40 = vmul.f32 0.6931472, %v963_v38  ;;  %v642_v41 = vpop.xlane.xlu1 %641 }
 0x331   :  { %964 = vlog2.f32 %v642_v41 }
 0x332   :  { %v681_v42 = vsub.f32 %v1222_v36, %v650_v40 }
 0x334   :  { %697 = vst [vmem:[#allocation10] sm:$0xff] %v681_v42 }
 0x337   :  { %v965_v34 = vpop.eup %964 }
 0x338   :  { %v674_v43 = vmul.f32 0.6931472, %v965_v34  ;;  %v622_v46 = vpop.xlane.xlu0 %621 }
 0x339   :  { %v620_v47 = vpop.xlane.xlu2 %619  ;;  %966 = vlog2.f32 %v622_v46 }
 0x33a   :  { %v693_v48 = vsub.f32 %v1225_v39, %v674_v43  ;;  %968 = vlog2.f32 %v620_v47 }
 0x33c   :  { %709 = vst [vmem:[#allocation10 + $0x60] sm:$0xff] %v693_v48 }
 0x33f   :  { %v967_v49 = vpop.eup %966 }
 0x340   :  { %v969_v51 = vpop.eup %968  ;;  %v654_v52 = vmul.f32 0.6931472, %v967_v49  ;;  %v624_v53 = vpop.xlane.xlu1 %623 }
 0x341   :  { %v652_v54 = vmul.f32 0.6931472, %v969_v51  ;;  %970 = vlog2.f32 %v624_v53 }
 0x342   :  { %v683_v56 = vsub.f32 %v1228_v44, %v654_v52 }
 0x343   :  { %v682_v36 = vsub.f32 %v1230_v45, %v652_v54 }
 0x344   :  { %699 = vst [vmem:[#allocation10 + $0x10] sm:$0xff] %v683_v56 }
 0x345   :  { %698 = vst [vmem:[#allocation10 + $0x8] sm:$0xff] %v682_v36 }
 0x347   :  { %v971_v57 = vpop.eup %970 }
 0x348   :  { %v656_v58 = vmul.f32 0.6931472, %v971_v57  ;;  %v626_v60 = vpop.xlane.xlu2 %625 }
 0x349   :  { %972 = vlog2.f32 %v626_v60 }
 0x34a   :  { %v684_v39 = vsub.f32 %v1234_v50, %v656_v58 }
 0x34c   :  { %700 = vst [vmem:[#allocation10 + $0x18] sm:$0xff] %v684_v39 }
 0x34f   :  { %v973_v61 = vpop.eup %972 }
 0x350   :  { %v658_v62 = vmul.f32 0.6931472, %v973_v61  ;;  %v628_v0 = vpop.xlane.xlu0 %627 }
 0x351   :  { %974 = vlog2.f32 %v628_v0 }
 0x352   :  { %v685_v1 = vsub.f32 %v1237_v55, %v658_v62 }
 0x354   :  { %701 = vst [vmem:[#allocation10 + $0x20] sm:$0xff] %v685_v1 }
 0x357   :  { %v975_v2 = vpop.eup %974 }
 0x358   :  { %v660_v44 = vmul.f32 0.6931472, %v975_v2  ;;  %v630_v4 = vpop.xlane.xlu1 %629 }
 0x359   :  { %976 = vlog2.f32 %v630_v4 }
 0x35a   :  { %v686_v45 = vsub.f32 %v1241_v59, %v660_v44 }
 0x35c   :  { %702 = vst [vmem:[#allocation10 + $0x28] sm:$0xff] %v686_v45 }
 0x35f   :  { %v977_v5 = vpop.eup %976 }
 0x360   :  { %v662_v6 = vmul.f32 0.6931472, %v977_v5  ;;  %v632_v8 = vpop.xlane.xlu2 %631 }
 0x361   :  { %978 = vlog2.f32 %v632_v8 }
 0x362   :  { %v687_v50 = vsub.f32 %v1245_v63, %v662_v6 }
 0x364   :  { %703 = vst [vmem:[#allocation10 + $0x30] sm:$0xff] %v687_v50 }
 0x367   :  { %v979_v9 = vpop.eup %978 }
 0x368   :  { %v664_v10 = vmul.f32 0.6931472, %v979_v9  ;;  %v634_v12 = vpop.xlane.xlu0 %633 }
 0x369   :  { %980 = vlog2.f32 %v634_v12 }
 0x36a   :  { %v688_v55 = vsub.f32 %v1249_v3, %v664_v10 }
 0x36c   :  { %704 = vst [vmem:[#allocation10 + $0x38] sm:$0xff] %v688_v55 }
 0x36f   :  { %v981_v13 = vpop.eup %980 }
 0x370   :  { %v666_v14 = vmul.f32 0.6931472, %v981_v13  ;;  %v636_v15 = vpop.xlane.xlu1 %635 }
 0x371   :  { %982 = vlog2.f32 %v636_v15 }
 0x372   :  { %v689_v59 = vsub.f32 %v1253_v7, %v666_v14 }
 0x374   :  { %705 = vst [vmem:[#allocation10 + $0x40] sm:$0xff] %v689_v59 }
 0x377   :  { %v983_v18 = vpop.eup %982 }
 0x378   :  { %v668_v19 = vmul.f32 0.6931472, %v983_v18  ;;  %v638_v20 = vpop.xlane.xlu2 %637 }
 0x379   :  { %984 = vlog2.f32 %v638_v20  ;;  %v648_v63 = vpop.xlane.xlu1 %647 }
 0x37a   :  { %v690_v21 = vsub.f32 %v1257_v11, %v668_v19  ;;  %986 = vlog2.f32 %v648_v63 }
 0x37c   :  { %706 = vst [vmem:[#allocation10 + $0x48] sm:$0xff] %v690_v21 }
 0x37f   :  { %v985_v22 = vpop.eup %984 }
 0x380   :  { %v987_v26 = vpop.eup %986  ;;  %v670_v3 = vmul.f32 0.6931472, %v985_v22  ;;  %v640_v27 = vpop.xlane.xlu0 %639 }
 0x381   :  { %v680_v28 = vmul.f32 0.6931472, %v987_v26  ;;  %v644_v29 = vpop.xlane.xlu2 %643  ;;  %988 = vlog2.f32 %v640_v27 }
 0x382   :  { %v691_v25 = vsub.f32 %v1261_v16, %v670_v3  ;;  %990 = vlog2.f32 %v644_v29 }
 0x383   :  { %v696_v7 = vsub.f32 %v1264_v17, %v680_v28 }
 0x384   :  { %707 = vst [vmem:[#allocation10 + $0x50] sm:$0xff] %v691_v25 }
 0x385   :  { %712 = vst [vmem:[#allocation10 + $0x78] sm:$0xff] %v696_v7 }
 0x387   :  { %v989_v31 = vpop.eup %988 }
 0x388   :  { %v991_v33 = vpop.eup %990  ;;  %v672_v35 = vmul.f32 0.6931472, %v989_v31  ;;  %v646_v11 = vpop.xlane.xlu0 %645 }
 0x389   :  { %v676_v32 = vmul.f32 0.6931472, %v991_v33  ;;  %992 = vlog2.f32 %v646_v11 }
 0x38a   :  { %v692_v37 = vsub.f32 %v1269_v23, %v672_v35 }
 0x38b   :  { %v694_v38 = vsub.f32 %v1272_v24, %v676_v32 }
 0x38c   :  { %708 = vst [vmem:[#allocation10 + $0x58] sm:$0xff] %v692_v37 }
 0x38d   :  { %710 = vst [vmem:[#allocation10 + $0x68] sm:$0xff] %v694_v38 }
 0x38f   :  { %v993_v16 = vpop.eup %992 }
 0x390   :  { %v678_v17 = vmul.f32 0.6931472, %v993_v16 }
 0x392   :  { %v695_v40 = vsub.f32 %v1277_v30, %v678_v17 }
 0x394   :  { %711 = vst [vmem:[#allocation10 + $0x70] sm:$0xff] %v695_v40 }
 0x395   :  { %725 = dma.vmem_to_hbm [thread:$0]  %s718_s23, 2048, %s720_s26, [#allocation4], %s1129_s27, %s1129_s27, %s1130_s28  }
 0x396   :  { %1120 = dma.done.wait [#allocation4], 2048  }
 0x397   :  { %1121 = vsyncadd [#allocation4], 4294965248 }
 0x398   :  { %730 = vsyncpa [#allocation3], 1 }
 0x399   :  { %731 = vsyncpa [#allocation6], 1 }
 0x39a   :  { %732 = vsyncpa [#allocation9], 1 }
 0x39b   :  { %733 = vsyncpa [#allocation4], 1 }

</bundles_post_ra>
